<compile_context>
chip_gen: v5e
topology: v5e:2x2
jax: 0.10.0
libtpu: 0.0.40
codegen_flags: <defaults>
</compile_context>

<pallas_src>
import jax
import jax.numpy as jnp
from jax.experimental import pallas as pl
from jax.experimental.pallas import tpu as pltpu


def _edge_dot_kernel(zs_ref, xd_ref, out_ref):
    # zs_ref / xd_ref: (D, TE) gathered source / destination features for this
    # edge tile, edges on lanes.  out_ref: (1, TE) per-edge dot products.
    prod = zs_ref[...].astype(jnp.float32) * xd_ref[...].astype(jnp.float32)
    out_ref[...] = jnp.sum(prod, axis=0, keepdims=True)


def _pick_edge_tile(d, itembytes):
    # 2 inputs x 2 pipeline buffers x (d * te * itembytes) <= ~6 MiB, which is
    # comfortably under every generation's default scoped VMEM (16 MiB on v5e,
    # 32 MiB on v6e/v7x).  Keep te a multiple of 128 for lane-dense tiles.
    budget = 6 * 1024 * 1024
    te = budget // (4 * d * itembytes)
    te = (te // 128) * 128
    return int(max(128, min(2048, te)))


def dot_product_decoder(z, x, src_idx, dst_idx, *, edge_tile=None):
    """Pallas implementation of DotProductDecoder.forward.

    z:        (N_s, D) source ('s') node features
    x:        (N_o, D) destination ('o') node features
    src_idx:  (E,) int32 source node index per 'so' edge
    dst_idx:  (E,) int32 destination node index per 'so' edge
    returns:  (E, 1) logits
    """
    assert z.shape[1] == x.shape[1]
    E = src_idx.shape[0]
    D = z.shape[1]
    itembytes = max(jnp.dtype(z.dtype).itemsize, jnp.dtype(x.dtype).itemsize)

    te = _pick_edge_tile(D, itembytes) if edge_tile is None else int(edge_tile)
    assert te % 128 == 0, "edge_tile must be a multiple of 128 (lane width)"

    e_pad = pl.cdiv(E, te) * te

    # Pad the (cheap) int32 index vectors, not the gathered (E, D) features.
    # Index 0 is a valid node id; padded rows are sliced off before return.
    src_p = jnp.pad(src_idx.astype(jnp.int32), (0, e_pad - E))
    dst_p = jnp.pad(dst_idx.astype(jnp.int32), (0, e_pad - E))

    # Row gather stays in JAX glue; the gathered features are written in a
    # (D, e_pad) layout so edges map to TPU lanes inside the kernel.
    # TODO(synk): fold the gather into the kernel (manual make_async_copy row
    # gather double-buffer over pl.ANY refs) for feature tables too large for
    # VMEM, removing the extra HBM write+read of the gathered arrays.
    z_src_t = jnp.take(z, src_p, axis=0).T   # (D, e_pad), native dtype
    x_dst_t = jnp.take(x, dst_p, axis=0).T   # (D, e_pad), native dtype

    grid_spec = pltpu.PrefetchScalarGridSpec(
        num_scalar_prefetch=0,
        grid=(e_pad // te,),
        in_specs=[
            pl.BlockSpec((D, te), lambda i: (0, i)),
            pl.BlockSpec((D, te), lambda i: (0, i)),
        ],
        out_specs=pl.BlockSpec((1, te), lambda i: (0, i)),
    )

    out_row = pl.pallas_call(
        _edge_dot_kernel,
        out_shape=jax.ShapeDtypeStruct((1, e_pad), jnp.float32),
        grid_spec=grid_spec,
        compiler_params=pltpu.CompilerParams(
            dimension_semantics=("parallel",)),
    )(z_src_t, x_dst_t)

    out_dtype = jnp.result_type(z.dtype, x.dtype)
    return out_row[0, :E][:, None].astype(out_dtype)


if __name__ == "__main__":
    key = jax.random.PRNGKey(0)
    k_z, k_x, k_src, k_dst = jax.random.split(key, 4)

    N_S, N_O, D, E = 16, 16, 32, 40  # small synthetic heterograph

    z = jax.random.normal(k_z, (N_S, D), dtype=jnp.float32)   # 's' node feats
    x = jax.random.normal(k_x, (N_O, D), dtype=jnp.float32)   # 'o' node feats
    src = jax.random.randint(k_src, (E,), 0, N_S, dtype=jnp.int32)
    dst = jax.random.randint(k_dst, (E,), 0, N_O, dtype=jnp.int32)

    logits = dot_product_decoder(z, x, src, dst)
    logits = jax.block_until_ready(logits)

    # Reference (pure JAX) check of the u_dot_v semantics.
    ref = jnp.sum(z[src] * x[dst], axis=-1, keepdims=True)
    assert logits.shape == (E, 1), logits.shape
    assert jnp.allclose(logits, ref, atol=1e-5, rtol=1e-5), "mismatch vs reference"

    print("KERNEL_OK")
</pallas_src>

<mosaic_0001>
module attributes {stable_mosaic.version = 11 : i64} {
  func.func @_edge_dot_kernel(%arg0: i32, %arg1: memref<32x2048xf32, #tpu.memory_space<vmem>>, %arg2: memref<32x2048xf32, #tpu.memory_space<vmem>>, %arg3: memref<1x2048xf32, #tpu.memory_space<vmem>>) attributes {dimension_semantics = [#tpu.dimension_semantics<parallel>], iteration_bounds = array<i64: 1>, scalar_prefetch = 0 : i64, scratch_operands = 0 : i64, tpu.core_type = #tpu.core_type<tc>, window_params = [{transform_indices = @transform_0, window_bounds = array<i64: 32, 2048>}, {transform_indices = @transform_1, window_bounds = array<i64: 32, 2048>}, {transform_indices = @transform_2, window_bounds = array<i64: 1, 2048>}]} {
    %c0 = arith.constant 0 : index
    %c0_0 = arith.constant 0 : index
    %0 = vector.load %arg1[%c0, %c0_0] : memref<32x2048xf32, #tpu.memory_space<vmem>>, vector<32x2048xf32>
    %c0_1 = arith.constant 0 : index
    %c0_2 = arith.constant 0 : index
    %1 = vector.load %arg2[%c0_1, %c0_2] : memref<32x2048xf32, #tpu.memory_space<vmem>>, vector<32x2048xf32>
    %2 = arith.mulf %0, %1 : vector<32x2048xf32>
    %cst = arith.constant dense<0.000000e+00> : vector<2048xf32>
    %3 = vector.multi_reduction <add>, %2, %cst [0] : vector<32x2048xf32> to vector<2048xf32>
    %4 = vector.shape_cast %3 : vector<2048xf32> to vector<1x2048xf32>
    %c0_3 = arith.constant 0 : index
    %c0_4 = arith.constant 0 : index
    %5 = vector.load %arg3[%c0_3, %c0_4] : memref<1x2048xf32, #tpu.memory_space<vmem>>, vector<1x2048xf32>
    tpu.vector_store %arg3[%c0_3, %c0_4], %4 {strides = array<i32>} : memref<1x2048xf32, #tpu.memory_space<vmem>>, vector<1x2048xf32>,
    return
  }
  func.func @transform_0(%arg0: i32) -> (i32, i32) {
    %c0_i32 = arith.constant 0 : i32
    %c0_i32_0 = arith.constant 0 : i32
    return %c0_i32, %arg0 : i32, i32
  }
  func.func @transform_1(%arg0: i32) -> (i32, i32) {
    %c0_i32 = arith.constant 0 : i32
    %c0_i32_0 = arith.constant 0 : i32
    return %c0_i32, %arg0 : i32, i32
  }
  func.func @transform_2(%arg0: i32) -> (i32, i32) {
    %c0_i32 = arith.constant 0 : i32
    %c0_i32_0 = arith.constant 0 : i32
    return %c0_i32, %arg0 : i32, i32
  }
}

</mosaic_0001>

<bundles_post_ra>
// kernel: tpu_custom_call.1
= control target key start
LH: loop header
LB: loop body
LE: loop exit
PB: predicated region body
PF: predicated region fallthrough
CT: control target
= control target key end

     0   :  { %7 = vsyncpa [#allocation3], 0  ;;  %s733_s0 = inlined_call_operand.hbm [shape: f32[32,2048], index: 0, kind: input, shape index: {}]   ;;  %s734_s1 = inlined_call_operand.hbm [shape: f32[32,2048], index: 1, kind: input, shape index: {}]   ;;  %s735_s2 = inlined_call_operand.hbm [shape: f32[1,2048], index: 2, kind: output, shape index: {}]  }
   0x1   :  { %8 = vsyncpa [#allocation6], 0 }
   0x2   :  { %9 = vsyncpa [#allocation4], 0  ;;  %s14_s11 = sshll.u32 %s733_s0, 4  ;;  %s536_s12 = smov [#allocation2]   ;;  %s15_s11 = int_to_ptr.hbm [resolvable:$true] %s14_s11 }
   0x3   :  { %s16_s13 = sshll.u32 %s536_s12, 4  ;;  %s27_s16 = sshll.u32 %s734_s1, 4  ;;  %s17_s13 = int_to_ptr.vmem [resolvable:$true] %s16_s13  ;;  %s28_s16 = int_to_ptr.hbm [resolvable:$true] %s27_s16 }
   0x4   :  { %s537_s17 = smov 2048   ;;  %s538_s18 = smov 128  }
   0x5   :  { %22 = dma.hbm_to_vmem [thread:$0]  %s15_s11, 8192, %s17_s13, [#allocation3], %s537_s17, %s537_s17, %s538_s18  }
   0x6   :  { %s539_s19 = smov [#allocation5]  }
   0x7   :  { %s29_s20 = sshll.u32 %s539_s19, 4  ;;  %s30_s20 = int_to_ptr.vmem [resolvable:$true] %s29_s20 }
   0x8   :  { %35 = dma.hbm_to_vmem [thread:$0]  %s28_s16, 8192, %s30_s20, [#allocation6], %s537_s17, %s537_s17, %s538_s18  }
   0x9   :  { %530 = dma.done.wait [#allocation3], 8192  }
   0xa   :  { %531 = vsyncadd [#allocation3], 4294959104 }
   0xb   :  { %532 = dma.done.wait [#allocation6], 8192  }
   0xc   :  { %533 = vsyncadd [#allocation6], 4294959104  ;;  %v44_v0 = vld [vmem:[#allocation2] sm:$0xff]  ;;  %v45_v1 = vld [vmem:[#allocation2 + $0x8] sm:$0xff]  ;;  %vm410_vm0 = vcmask 1040384   ;;  %vm412_vm1 = vcmask 1042434  }
   0xd   :  { %v46_v2 = vld [vmem:[#allocation2 + $0x10] sm:$0xff]  ;;  %v47_v3 = vld [vmem:[#allocation2 + $0x18] sm:$0xff]  ;;  %v48_v4 = vld [vmem:[#allocation2 + $0x20] sm:$0xff]  ;;  %vm414_vm2 = vcmask 1041408   ;;  %vm416_vm3 = vcmask 1044484   ;;  %vm418_vm4 = vcmask 1046534  }
   0xe   :  { %v49_v5 = vld [vmem:[#allocation2 + $0x28] sm:$0xff]  ;;  %v50_v6 = vld [vmem:[#allocation2 + $0x30] sm:$0xff]  ;;  %v51_v7 = vld [vmem:[#allocation2 + $0x38] sm:$0xff]  ;;  %vm420_vm5 = vcmask 1045508   ;;  %s540_s0 = smov [#allocation7]   ;;  %s442_s23 = sshll.u32 %s735_s2, 4  ;;  %s443_s23 = int_to_ptr.hbm [resolvable:$true] %s442_s23 }
   0xf   :  { %v52_v8 = vld [vmem:[#allocation2 + $0x40] sm:$0xff]  ;;  %v53_v9 = vld [vmem:[#allocation2 + $0x48] sm:$0xff]  ;;  %v54_v10 = vld [vmem:[#allocation2 + $0x50] sm:$0xff]  ;;  %s440_s1 = sshll.u32 %s540_s0, 4  ;;  %vm422_vm6 = vcmask 1043456   ;;  %s441_s1 = int_to_ptr.vmem [resolvable:$true] %s440_s1 }
  0x10   :  { %v55_v11 = vld [vmem:[#allocation2 + $0x58] sm:$0xff]  ;;  %v108_v12 = vld [vmem:[#allocation5] sm:$0xff]  ;;  %v109_v13 = vld [vmem:[#allocation5 + $0x8] sm:$0xff] }
  0x11   :  { %v56_v14 = vld [vmem:[#allocation2 + $0x60] sm:$0xff]  ;;  %v57_v15 = vld [vmem:[#allocation2 + $0x68] sm:$0xff]  ;;  %v58_v16 = vld [vmem:[#allocation2 + $0x70] sm:$0xff]  ;;  %v172_v34 = vmul.f32 %v108_v12, %v44_v0  ;;  %v173_v35 = vmul.f32 %v109_v13, %v45_v1 }
  0x12   :  { %v60_v17 = vld [vmem:[#allocation2 + $0x80] sm:$0xff]  ;;  %v110_v18 = vld [vmem:[#allocation5 + $0x10] sm:$0xff]  ;;  %v111_v19 = vld [vmem:[#allocation5 + $0x18] sm:$0xff] }
  0x13   :  { %v112_v20 = vld [vmem:[#allocation5 + $0x20] sm:$0xff]  ;;  %v59_v21 = vld [vmem:[#allocation2 + $0x78] sm:$0xff]  ;;  %v61_v22 = vld [vmem:[#allocation2 + $0x88] sm:$0xff]  ;;  %v562_v36 = vmul.f32 %v110_v18, %v46_v2  ;;  %v564_v37 = vmul.f32 %v111_v19, %v47_v3 }
  0x14   :  { %v62_v23 = vld [vmem:[#allocation2 + $0x90] sm:$0xff]  ;;  %v63_v24 = vld [vmem:[#allocation2 + $0x98] sm:$0xff]  ;;  %v113_v25 = vld [vmem:[#allocation5 + $0x28] sm:$0xff]  ;;  %v566_v44 = vmul.f32 %v112_v20, %v48_v4 }
  0x15   :  { %v114_v26 = vld [vmem:[#allocation5 + $0x30] sm:$0xff]  ;;  %v115_v27 = vld [vmem:[#allocation5 + $0x38] sm:$0xff]  ;;  %v64_v28 = vld [vmem:[#allocation2 + $0xa0] sm:$0xff]  ;;  %v568_v45 = vmul.f32 %v113_v25, %v49_v5 }
  0x16   :  { %v65_v29 = vld [vmem:[#allocation2 + $0xa8] sm:$0xff]  ;;  %v66_v30 = vld [vmem:[#allocation2 + $0xb0] sm:$0xff]  ;;  %v116_v31 = vld [vmem:[#allocation5 + $0x40] sm:$0xff]  ;;  %v570_v46 = vmul.f32 %v114_v26, %v50_v6  ;;  %v572_v47 = vmul.f32 %v115_v27, %v51_v7 }
  0x17   :  { %v117_v32 = vld [vmem:[#allocation5 + $0x48] sm:$0xff]  ;;  %v118_v33 = vld [vmem:[#allocation5 + $0x50] sm:$0xff]  ;;  %v67_v38 = vld [vmem:[#allocation2 + $0xb8] sm:$0xff]  ;;  %v574_v54 = vmul.f32 %v116_v31, %v52_v8 }
  0x18   :  { %v68_v39 = vld [vmem:[#allocation2 + $0xc0] sm:$0xff]  ;;  %v69_v40 = vld [vmem:[#allocation2 + $0xc8] sm:$0xff]  ;;  %v119_v41 = vld [vmem:[#allocation5 + $0x58] sm:$0xff]  ;;  %v576_v55 = vmul.f32 %v117_v32, %v53_v9  ;;  %v578_v56 = vmul.f32 %v118_v33, %v54_v10 }
  0x19   :  { %v120_v42 = vld [vmem:[#allocation5 + $0x60] sm:$0xff]  ;;  %v121_v43 = vld [vmem:[#allocation5 + $0x68] sm:$0xff]  ;;  %v70_v48 = vld [vmem:[#allocation2 + $0xd0] sm:$0xff]  ;;  %v580_v57 = vmul.f32 %v119_v41, %v55_v11 }
  0x1a   :  { %v71_v49 = vld [vmem:[#allocation2 + $0xd8] sm:$0xff]  ;;  %v72_v50 = vld [vmem:[#allocation2 + $0xe0] sm:$0xff]  ;;  %v122_v51 = vld [vmem:[#allocation5 + $0x70] sm:$0xff]  ;;  %v582_v0 = vmul.f32 %v120_v42, %v56_v14  ;;  %v584_v1 = vmul.f32 %v121_v43, %v57_v15 }
  0x1b   :  { %v123_v52 = vld [vmem:[#allocation5 + $0x78] sm:$0xff]  ;;  %v124_v53 = vld [vmem:[#allocation5 + $0x80] sm:$0xff]  ;;  %736 = vst [vmem:[#allocation11_spill] sm:$0xff] %v580_v57  ;;  %v73_v58 = vld [vmem:[#allocation2 + $0xe8] sm:$0xff]  ;;  %v586_v2 = vmul.f32 %v122_v51, %v58_v16 }
  0x1c   :  { %v74_v59 = vld [vmem:[#allocation2 + $0xf0] sm:$0xff]  ;;  %v75_v60 = vld [vmem:[#allocation2 + $0xf8] sm:$0xff]  ;;  %v125_v61 = vld [vmem:[#allocation5 + $0x88] sm:$0xff]  ;;  %737 = vst [vmem:[#allocation12_spill] sm:$0xff] %v582_v0  ;;  %v188_v3 = vmul.f32 %v124_v53, %v60_v17  ;;  %v588_v10 = vmul.f32 %v123_v52, %v59_v21 }
  0x1d   :  { %v126_v62 = vld [vmem:[#allocation5 + $0x90] sm:$0xff]  ;;  %v127_v63 = vld [vmem:[#allocation5 + $0x98] sm:$0xff]  ;;  %738 = vst [vmem:[#allocation13_spill] sm:$0xff] %v584_v1  ;;  %v76_v4 = vld [vmem:[#allocation2 + $0x100] sm:$0xff]  ;;  %v189_v11 = vmul.f32 %v125_v61, %v61_v22 }
  0x1e   :  { %739 = vst [vmem:[#allocation14_spill] sm:$0xff] %v586_v2  ;;  %v77_v5 = vld [vmem:[#allocation2 + $0x108] sm:$0xff]  ;;  %v78_v6 = vld [vmem:[#allocation2 + $0x110] sm:$0xff]  ;;  %v128_v7 = vld [vmem:[#allocation5 + $0xa0] sm:$0xff]  ;;  %v190_v12 = vmul.f32 %v126_v62, %v62_v23  ;;  %v191_v13 = vmul.f32 %v127_v63, %v63_v24  ;;  %v236_v27 = vadd.f32 %v188_v3, %v172_v34 }
  0x1f   :  { %v129_v8 = vld [vmem:[#allocation5 + $0xa8] sm:$0xff]  ;;  %v130_v9 = vld [vmem:[#allocation5 + $0xb0] sm:$0xff]  ;;  %740 = vst [vmem:[#allocation15_spill] sm:$0xff] %v588_v10  ;;  %v79_v18 = vld [vmem:[#allocation2 + $0x118] sm:$0xff]  ;;  %v192_v16 = vmul.f32 %v128_v7, %v64_v28  ;;  %v245_v43 = vadd.f32 %v189_v11, %v173_v35 }
  0x20   :  { %v80_v19 = vld [vmem:[#allocation2 + $0x120] sm:$0xff]  ;;  %v81_v14 = vld [vmem:[#allocation2 + $0x128] sm:$0xff]  ;;  %v131_v20 = vld [vmem:[#allocation5 + $0xb8] sm:$0xff]  ;;  %v193_v26 = vmul.f32 %v129_v8, %v65_v29  ;;  %v590_v17 = vmul.f32 %v130_v9, %v66_v30 }
  0x21   :  { %v132_v15 = vld [vmem:[#allocation5 + $0xc0] sm:$0xff]  ;;  %v133_v25 = vld [vmem:[#allocation5 + $0xc8] sm:$0xff]  ;;  %v82_v31 = vld [vmem:[#allocation2 + $0x130] sm:$0xff]  ;;  %v592_v22 = vmul.f32 %v131_v20, %v67_v38  ;;  %v254_v38 = vadd.f32 %v190_v12, %v562_v36 }
  0x22   :  { %v83_v32 = vld [vmem:[#allocation2 + $0x138] sm:$0xff]  ;;  %v84_v33 = vld [vmem:[#allocation2 + $0x140] sm:$0xff]  ;;  %v134_v41 = vld [vmem:[#allocation5 + $0xd0] sm:$0xff]  ;;  %v594_v23 = vmul.f32 %v132_v15, %v68_v39  ;;  %v596_v24 = vmul.f32 %v133_v25, %v69_v40 }
  0x23   :  { %v135_v21 = vld [vmem:[#allocation5 + $0xd8] sm:$0xff]  ;;  %v136_v42 = vld [vmem:[#allocation5 + $0xe0] sm:$0xff]  ;;  %v85_v51 = vld [vmem:[#allocation2 + $0x148] sm:$0xff]  ;;  %v598_v34 = vmul.f32 %v134_v41, %v70_v48  ;;  %v263_v48 = vadd.f32 %v191_v13, %v564_v37  ;;  %v616_v13 = vadd.f32 %v193_v26, %v568_v45 }
  0x24   :  { %v86_v52 = vld [vmem:[#allocation2 + $0x150] sm:$0xff]  ;;  %v87_v28 = vld [vmem:[#allocation2 + $0x158] sm:$0xff]  ;;  %v137_v29 = vld [vmem:[#allocation5 + $0xe8] sm:$0xff]  ;;  %v600_v61 = vmul.f32 %v135_v21, %v71_v49  ;;  %v602_v62 = vmul.f32 %v136_v42, %v72_v50  ;;  %v272_v42 = vadd.f32 %v192_v16, %v566_v44 }
  0x25   :  { %v138_v30 = vld [vmem:[#allocation5 + $0xf0] sm:$0xff]  ;;  %v139_v53 = vld [vmem:[#allocation5 + $0xf8] sm:$0xff]  ;;  %741 = vst [vmem:[#allocation16_spill] sm:$0xff] %v598_v34  ;;  %v88_v63 = vld [vmem:[#allocation2 + $0x160] sm:$0xff]  ;;  %v605_v8 = vmul.f32 %v137_v29, %v73_v58 }
  0x26   :  { %742 = vst [vmem:[#allocation17_spill] sm:$0xff] %v600_v61  ;;  %v89_v39 = vld [vmem:[#allocation2 + $0x168] sm:$0xff]  ;;  %v90_v3 = vld [vmem:[#allocation2 + $0x170] sm:$0xff]  ;;  %v140_v40 = vld [vmem:[#allocation5 + $0x100] sm:$0xff]  ;;  %v607_v9 = vmul.f32 %v138_v30, %v74_v59  ;;  %v609_v11 = vmul.f32 %v139_v53, %v75_v60 }
  0x27   :  { %743 = vst [vmem:[#allocation18_spill] sm:$0xff] %v602_v62  ;;  %v141_v7 = vld [vmem:[#allocation5 + $0x108] sm:$0xff]  ;;  %v142_v35 = vld [vmem:[#allocation5 + $0x110] sm:$0xff]  ;;  %v91_v49 = vld [vmem:[#allocation2 + $0x178] sm:$0xff]  ;;  %v204_v12 = vmul.f32 %v140_v40, %v76_v4 }
  0x28   :  { %744 = vst [vmem:[#allocation19_spill] sm:$0xff] %v605_v8  ;;  %v92_v20 = vld [vmem:[#allocation2 + $0x180] sm:$0xff]  ;;  %v93_v50 = vld [vmem:[#allocation2 + $0x188] sm:$0xff]  ;;  %v143_v15 = vld [vmem:[#allocation5 + $0x118] sm:$0xff]  ;;  %v205_v41 = vmul.f32 %v141_v7, %v77_v5  ;;  %v206_v21 = vmul.f32 %v142_v35, %v78_v6 }
  0x29   :  { %745 = vst [vmem:[#allocation20_spill] sm:$0xff] %v607_v9  ;;  %v144_v25 = vld [vmem:[#allocation5 + $0x120] sm:$0xff]  ;;  %v145_v36 = vld [vmem:[#allocation5 + $0x128] sm:$0xff]  ;;  %v94_v10 = vld [vmem:[#allocation2 + $0x190] sm:$0xff]  ;;  %v207_v53 = vmul.f32 %v143_v15, %v79_v18  ;;  %v237_v35 = vadd.f32 %v236_v27, %v204_v12 }
  0x2a   :  { %746 = vst [vmem:[#allocation21_spill] sm:$0xff] %v609_v11  ;;  %v95_v58 = vld [vmem:[#allocation2 + $0x198] sm:$0xff]  ;;  %v96_v29 = vld [vmem:[#allocation2 + $0x1a0] sm:$0xff]  ;;  %v146_v59 = vld [vmem:[#allocation5 + $0x130] sm:$0xff]  ;;  %v208_v11 = vmul.f32 %v144_v25, %v80_v19  ;;  %v613_v37 = vmul.f32 %v145_v36, %v81_v14  ;;  %v246_v1 = vadd.f32 %v245_v43, %v205_v41  ;;  %v255_v0 = vadd.f32 %v254_v38, %v206_v21 }
  0x2b   :  { %v147_v30 = vld [vmem:[#allocation5 + $0x138] sm:$0xff]  ;;  %v148_v60 = vld [vmem:[#allocation5 + $0x140] sm:$0xff]  ;;  %v97_v9 = vld [vmem:[#allocation2 + $0x1a8] sm:$0xff]  ;;  %v618_v44 = vmul.f32 %v146_v59, %v82_v31 }
  0x2c   :  { %v98_v2 = vld [vmem:[#allocation2 + $0x1b0] sm:$0xff]  ;;  %v99_v4 = vld [vmem:[#allocation2 + $0x1b8] sm:$0xff]  ;;  %v149_v5 = vld [vmem:[#allocation5 + $0x148] sm:$0xff]  ;;  %v620_v16 = vmul.f32 %v147_v30, %v83_v32  ;;  %v622_v7 = vmul.f32 %v148_v60, %v84_v33 }
  0x2d   :  { %v150_v6 = vld [vmem:[#allocation5 + $0x150] sm:$0xff]  ;;  %v151_v40 = vld [vmem:[#allocation5 + $0x158] sm:$0xff]  ;;  %v100_v18 = vld [vmem:[#allocation2 + $0x1c0] sm:$0xff]  ;;  %v624_v26 = vmul.f32 %v149_v5, %v85_v51 }
  0x2e   :  { %v101_v19 = vld [vmem:[#allocation2 + $0x1c8] sm:$0xff]  ;;  %v102_v14 = vld [vmem:[#allocation2 + $0x1d0] sm:$0xff]  ;;  %v152_v15 = vld [vmem:[#allocation5 + $0x160] sm:$0xff]  ;;  %v626_v36 = vmul.f32 %v150_v6, %v86_v52  ;;  %v628_v8 = vmul.f32 %v151_v40, %v87_v28 }
  0x2f   :  { %v153_v25 = vld [vmem:[#allocation5 + $0x168] sm:$0xff]  ;;  %v154_v45 = vld [vmem:[#allocation5 + $0x170] sm:$0xff]  ;;  %v103_v31 = vld [vmem:[#allocation2 + $0x1d8] sm:$0xff]  ;;  %v630_v27 = vmul.f32 %v152_v15, %v88_v63 }
  0x30   :  { %747 = vst [vmem:[#allocation22_spill] sm:$0xff] %v626_v36  ;;  %v104_v59 = vld [vmem:[#allocation2 + $0x1e0] sm:$0xff]  ;;  %v105_v32 = vld [vmem:[#allocation2 + $0x1e8] sm:$0xff]  ;;  %v155_v30 = vld [vmem:[#allocation5 + $0x178] sm:$0xff]  ;;  %v632_v12 = vmul.f32 %v153_v25, %v89_v39  ;;  %v634_v62 = vmul.f32 %v154_v45, %v90_v3  ;;  %v273_v25 = vadd.f32 %v272_v42, %v208_v11 }
  0x31   :  { %748 = vst [vmem:[#allocation23_spill] sm:$0xff] %v628_v8  ;;  %v156_v33 = vld [vmem:[#allocation5 + $0x180] sm:$0xff]  ;;  %v157_v60 = vld [vmem:[#allocation5 + $0x188] sm:$0xff]  ;;  %v106_v51 = vld [vmem:[#allocation2 + $0x1f0] sm:$0xff]  ;;  %v636_v40 = vmul.f32 %v155_v30, %v91_v49  ;;  %v264_v8 = vadd.f32 %v263_v48, %v207_v53 }
  0x32   :  { %749 = vst [vmem:[#allocation24_spill] sm:$0xff] %v630_v27  ;;  %v107_v5 = vld [vmem:[#allocation2 + $0x1f8] sm:$0xff]  ;;  %v158_v52 = vld [vmem:[#allocation5 + $0x190] sm:$0xff]  ;;  %v160_v28 = vld [vmem:[#allocation5 + $0x1a0] sm:$0xff]  ;;  %v220_v43 = vmul.f32 %v156_v33, %v92_v20  ;;  %v221_v41 = vmul.f32 %v157_v60, %v93_v50 }
  0x33   :  { %750 = vst [vmem:[#allocation25_spill] sm:$0xff] %v632_v12  ;;  %v159_v6 = vld [vmem:[#allocation5 + $0x198] sm:$0xff]  ;;  %v161_v36 = vld [vmem:[#allocation5 + $0x1a8] sm:$0xff]  ;;  %v162_v61 = vld [vmem:[#allocation5 + $0x1b0] sm:$0xff]  ;;  %v222_v63 = vmul.f32 %v158_v52, %v94_v10  ;;  %v224_v39 = vmul.f32 %v160_v28, %v96_v29 }
  0x34   :  { %751 = vst [vmem:[#allocation26_spill] sm:$0xff] %v634_v62  ;;  %v163_v57 = vld [vmem:[#allocation5 + $0x1b8] sm:$0xff]  ;;  %v223_v15 = vmul.f32 %v159_v6, %v95_v58  ;;  %v164_v3 = vld [vmem:[#allocation5 + $0x1c0] sm:$0xff]  ;;  %v165_v45 = vld [vmem:[#allocation5 + $0x1c8] sm:$0xff]  ;;  %v225_v21 = vmul.f32 %v161_v36, %v97_v9  ;;  %v226_v62 = vmul.f32 %v162_v61, %v98_v2  ;;  %v238_v27 = vadd.f32 %v237_v35, %v220_v43 }
  0x35   :  { %v166_v38 = vld [vmem:[#allocation5 + $0x1d0] sm:$0xff]  ;;  %v227_v12 = vmul.f32 %v163_v57, %v99_v4  ;;  %v167_v34 = vld [vmem:[#allocation5 + $0x1d8] sm:$0xff]  ;;  %v168_v49 = vld [vmem:[#allocation5 + $0x1e0] sm:$0xff]  ;;  %v638_v20 = vmul.f32 %v164_v3, %v100_v18  ;;  %v640_v48 = vmul.f32 %v165_v45, %v101_v19  ;;  %v247_v10 = vadd.f32 %v246_v1, %v221_v41 }
  0x36   :  { %v169_v30 = vld [vmem:[#allocation5 + $0x1e8] sm:$0xff]  ;;  %v642_v50 = vmul.f32 %v166_v38, %v102_v14  ;;  %v170_v58 = vld [vmem:[#allocation5 + $0x1f0] sm:$0xff]  ;;  %v171_v29 = vld [vmem:[#allocation5 + $0x1f8] sm:$0xff]  ;;  %v644_v11 = vmul.f32 %v167_v34, %v103_v31  ;;  %v646_v42 = vmul.f32 %v168_v49, %v104_v59  ;;  %v239_v57 = vrot.slane %v238_v27, 4 }
  0x37   :  { %v648_v9 = vmul.f32 %v169_v30, %v105_v32  ;;  %v650_v2 = vmul.f32 %v170_v58, %v106_v51  ;;  %v652_v61 = vmul.f32 %v171_v29, %v107_v5  ;;  %v248_v53 = vrot.slane %v247_v10, 4 }
  0x38   :  { %v256_v4 = vadd.f32 %v255_v0, %v222_v63  ;;  %v240_v35 = vadd.f32 %v239_v57, %v238_v27  ;;  %v265_v18 = vadd.f32 %v264_v8, %v223_v15  ;;  %v274_v19 = vadd.f32 %v273_v25, %v224_v39 }
  0x39   :  { %v282_v1 = vadd.f32 %v616_v13, %v613_v37  ;;  %v249_v14 = vadd.f32 %v248_v53, %v247_v10  ;;  %v290_v36 = vadd.f32 %v590_v17, %v570_v46  ;;  %v299_v31 = vadd.f32 %v592_v22, %v572_v47 }
  0x3a   :  { %v257_v34 = vrot.slane %v256_v4, 4  ;;  %v241_v59 = vrot.slane %v240_v35, 2  ;;  %v266_v32 = vrot.slane %v265_v18, 4  ;;  %v275_v33 = vrot.slane %v274_v19, 4 }
  0x3b   :  { %v283_v60 = vadd.f32 %v282_v1, %v225_v21  ;;  %v250_v51 = vrot.slane %v249_v14, 2  ;;  %v291_v8 = vadd.f32 %v290_v36, %v618_v44  ;;  %v300_v27 = vadd.f32 %v299_v31, %v620_v16 }
  0x3c   :  { %v258_v0 = vadd.f32 %v257_v34, %v256_v4  ;;  %v242_v5 = vadd.f32 %v241_v59, %v240_v35  ;;  %v267_v37 = vadd.f32 %v266_v32, %v265_v18  ;;  %v276_v13 = vadd.f32 %v275_v33, %v274_v19  ;;  %v753_v32 = vld [vmem:[#allocation11_spill] sm:$0xff]  ;;  %v755_v33 = vld [vmem:[#allocation12_spill] sm:$0xff] }
  0x3d   :  { %v284_v52 = vrot.slane %v283_v60, 4  ;;  %v251_v6 = vadd.f32 %v250_v51, %v249_v14  ;;  %v292_v46 = vadd.f32 %v291_v8, %v226_v62  ;;  %v301_v17 = vadd.f32 %v300_v27, %v227_v12  ;;  %v757_v27 = vld [vmem:[#allocation22_spill] sm:$0xff] }
  0x3e   :  { %v259_v28 = vrot.slane %v258_v0, 2  ;;  %v243_v43 = vrot.slane %v242_v5, 1  ;;  %v268_v47 = vrot.slane %v267_v37, 2  ;;  %v277_v22 = vrot.slane %v276_v13, 2 }
  0x3f   :  { %v285_v41 = vadd.f32 %v284_v52, %v283_v60  ;;  %v252_v63 = vrot.slane %v251_v6, 1  ;;  %v293_v39 = vrot.slane %v292_v46, 4  ;;  %v302_v25 = vrot.slane %v301_v17, 4  ;;  %v756_v60 = vld [vmem:[#allocation18_spill] sm:$0xff] }
  0x40   :  { %v260_v15 = vadd.f32 %v259_v28, %v258_v0  ;;  %v662_v3 = vadd.f32 %v243_v43, %v242_v5  ;;  %v269_v44 = vadd.f32 %v268_v47, %v267_v37  ;;  %v278_v16 = vadd.f32 %v277_v22, %v276_v13  ;;  %v758_v37 = vld [vmem:[#allocation23_spill] sm:$0xff] }
  0x41   :  { %v286_v45 = vrot.slane %v285_v41, 2  ;;  %v664_v38 = vadd.f32 %v252_v63, %v251_v6  ;;  %v294_v49 = vadd.f32 %v293_v39, %v292_v46  ;;  %v303_v30 = vadd.f32 %v302_v25, %v301_v17  ;;  %v760_v6 = vld [vmem:[#allocation13_spill] sm:$0xff]  ;;  %v761_v28 = vld [vmem:[#allocation19_spill] sm:$0xff] }
  0x42   :  { %v261_v21 = vrot.slane %v260_v15, 1  ;;  %v270_v62 = vrot.slane %v269_v44, 1  ;;  %v279_v12 = vrot.slane %v278_v16, 1  ;;  %v308_v58 = vadd.f32 %v594_v23, %v574_v54  ;;  %v752_v54 = vld [vmem:[#allocation16_spill] sm:$0xff]  ;;  %v762_v63 = vld [vmem:[#allocation25_spill] sm:$0xff] }
  0x43   :  { %v287_v10 = vadd.f32 %v286_v45, %v285_v41  ;;  %v295_v57 = vrot.slane %v294_v49, 2  ;;  %v304_v53 = vrot.slane %v303_v30, 2  ;;  %v317_v4 = vadd.f32 %v596_v24, %v576_v55  ;;  %v754_v55 = vld [vmem:[#allocation17_spill] sm:$0xff] }
  0x44   :  { %v668_v29 = vadd.f32 %v261_v21, %v260_v15  ;;  %v672_v35 = vadd.f32 %v270_v62, %v269_v44  ;;  %v674_v18 = vadd.f32 %v279_v12, %v278_v16  ;;  %v309_v1 = vadd.f32 %v308_v58, %v622_v7  ;;  %v763_v44 = vld [vmem:[#allocation14_spill] sm:$0xff]  ;;  %v764_v16 = vld [vmem:[#allocation20_spill] sm:$0xff]  ;;  %v765_v21 = vld [vmem:[#allocation15_spill] sm:$0xff] }
  0x45   :  { %v288_v19 = vrot.slane %v287_v10, 1  ;;  %v296_v14 = vadd.f32 %v295_v57, %v294_v49  ;;  %v305_v34 = vadd.f32 %v304_v53, %v303_v30  ;;  %v318_v36 = vadd.f32 %v317_v4, %v624_v26  ;;  %v766_v49 = vld [vmem:[#allocation21_spill] sm:$0xff] }
  0x46   :  { %v326_v23 = vadd.f32 %v752_v54, %v578_v56  ;;  %v310_v59 = vadd.f32 %v309_v1, %v638_v20  ;;  %v335_v24 = vadd.f32 %v754_v55, %v753_v32  ;;  %v344_v51 = vadd.f32 %v756_v60, %v755_v33  ;;  %v759_v56 = vld [vmem:[#allocation24_spill] sm:$0xff] }
  0x47   :  { %v680_v31 = vadd.f32 %v288_v19, %v287_v10  ;;  %v297_v0 = vrot.slane %v296_v14, 1  ;;  %v306_v8 = vrot.slane %v305_v34, 1  ;;  %v319_v7 = vadd.f32 %v318_v36, %v640_v48 }
  0x48   :  { %v327_v5 = vadd.f32 %v326_v23, %v757_v27  ;;  %v311_v26 = vrot.slane %v310_v59, 4  ;;  %v336_v13 = vadd.f32 %v335_v24, %v758_v37  ;;  %v345_v52 = vadd.f32 %v344_v51, %v759_v56 }
  0x49   :  { %v353_v20 = vadd.f32 %v761_v28, %v760_v6  ;;  %v693_v46 = vadd.f32 %v297_v0, %v296_v14  ;;  %v695_v17 = vadd.f32 %v306_v8, %v305_v34  ;;  %v320_v43 = vrot.slane %v319_v7, 4 }
  0x4a   :  { %v328_v47 = vadd.f32 %v327_v5, %v642_v50  ;;  %v312_v22 = vadd.f32 %v311_v26, %v310_v59  ;;  %v337_v48 = vadd.f32 %v336_v13, %v644_v11  ;;  %v346_v41 = vadd.f32 %v345_v52, %v646_v42  ;;  %v767_v11 = vld [vmem:[#allocation26_spill] sm:$0xff] }
  0x4b   :  { %v354_v15 = vadd.f32 %v353_v20, %v762_v63  ;;  %v321_v39 = vadd.f32 %v320_v43, %v319_v7  ;;  %v362_v45 = vadd.f32 %v764_v16, %v763_v44  ;;  %v371_v30 = vadd.f32 %v766_v49, %v765_v21 }
  0x4c   :  { %v329_v25 = vrot.slane %v328_v47, 4  ;;  %v313_v62 = vrot.slane %v312_v22, 2  ;;  %v338_v12 = vrot.slane %v337_v48, 4  ;;  %v347_v10 = vrot.slane %v346_v41, 4 }
  0x4d   :  { %v355_v50 = vadd.f32 %v354_v15, %v648_v9  ;;  %v322_v58 = vrot.slane %v321_v39, 2  ;;  %v363_v53 = vadd.f32 %v362_v45, %v767_v11  ;;  %v372_v42 = vadd.f32 %v371_v30, %v636_v40 }
  0x4e   :  { %v330_v57 = vadd.f32 %v329_v25, %v328_v47  ;;  %v314_v4 = vadd.f32 %v313_v62, %v312_v22  ;;  %v339_v19 = vadd.f32 %v338_v12, %v337_v48  ;;  %v348_v1 = vadd.f32 %v347_v10, %v346_v41 }
  0x4f   :  { %v356_v14 = vrot.slane %v355_v50, 4  ;;  %v323_v34 = vadd.f32 %v322_v58, %v321_v39  ;;  %v364_v54 = vadd.f32 %v363_v53, %v650_v2  ;;  %v373_v23 = vadd.f32 %v372_v42, %v652_v61 }
  0x50   :  { %v331_v36 = vrot.slane %v330_v57, 2  ;;  %v315_v59 = vrot.slane %v314_v4, 1  ;;  %v340_v32 = vrot.slane %v339_v19, 2  ;;  %v349_v55 = vrot.slane %v348_v1, 2 }
  0x51   :  { %v357_v9 = vadd.f32 %v356_v14, %v355_v50  ;;  %v324_v24 = vrot.slane %v323_v34, 1  ;;  %v365_v60 = vrot.slane %v364_v54, 4  ;;  %v374_v51 = vrot.slane %v373_v23, 4 }
  0x52   :  { %v332_v33 = vadd.f32 %v331_v36, %v330_v57  ;;  %v316_v0 = vadd.f32 %v315_v59, %v314_v4  ;;  %v341_v40 = vadd.f32 %v340_v32, %v339_v19  ;;  %v350_v8 = vadd.f32 %v349_v55, %v348_v1 }
  0x53   :  { %v358_v7 = vrot.slane %v357_v9, 2  ;;  %v325_v27 = vadd.f32 %v324_v24, %v323_v34  ;;  %v366_v26 = vadd.f32 %v365_v60, %v364_v54  ;;  %v375_v37 = vadd.f32 %v374_v51, %v373_v23 }
  0x54   :  { %v333_v5 = vrot.slane %v332_v33, 1  ;;  %v342_v13 = vrot.slane %v341_v40, 1  ;;  %v351_v2 = vrot.slane %v350_v8, 1  ;;  %v396_v61 = vrot.slane %v664_v38, 7 }
  0x55   :  { %v359_v56 = vadd.f32 %v358_v7, %v357_v9  ;;  %v367_v6 = vrot.slane %v366_v26, 2  ;;  %v376_v28 = vrot.slane %v375_v37, 2  ;;  %v397_v20 = vrot.slane %v668_v29, 6 }
  0x56   :  { %v334_v52 = vadd.f32 %v333_v5, %v332_v33  ;;  %v343_v43 = vadd.f32 %v342_v13, %v341_v40  ;;  %v352_v47 = vadd.f32 %v351_v2, %v350_v8  ;;  %v398_v48 = vrot.slane %v672_v35, 5 }
  0x57   :  { %v360_v22 = vrot.slane %v359_v56, 1  ;;  %v368_v41 = vadd.f32 %v367_v6, %v366_v26  ;;  %v377_v63 = vadd.f32 %v376_v28, %v375_v37  ;;  %v399_v15 = vrot.slane %v674_v18, 4 }
  0x58   :  { %v400_v39 = vrot.slane %v680_v31, 3  ;;  %v401_v44 = vrot.slane %v693_v46, 2  ;;  %v402_v38 = vrot.slane %v695_v17, 1  ;;  %v403_v16 = vrot.slane %v325_v27, 7 }
  0x59   :  { %v361_v25 = vadd.f32 %v360_v22, %v359_v56  ;;  %v369_v45 = vrot.slane %v368_v41, 1  ;;  %v378_v21 = vrot.slane %v377_v63, 1  ;;  %v404_v29 = vrot.slane %v334_v52, 6 }
  0x5a   :  { %v405_v49 = vrot.slane %v343_v43, 5  ;;  %v406_v30 = vrot.slane %v352_v47, 4  ;;  %v411_v18 = vsel %vm410_vm0, %v662_v3, %v396_v61  ;;  %v413_v31 = vsel %vm412_vm1, %v397_v20, %v398_v48 }
  0x5b   :  { %v407_v62 = vrot.slane %v361_v25, 3  ;;  %v370_v35 = vadd.f32 %v369_v45, %v368_v41  ;;  %v379_v12 = vadd.f32 %v378_v21, %v377_v63  ;;  %v415_v10 = vsel %vm414_vm2, %v411_v18, %v413_v31 }
  0x5c   :  { %v417_v50 = vsel %vm416_vm3, %v399_v15, %v400_v39  ;;  %v419_v3 = vsel %vm418_vm4, %v401_v44, %v402_v38  ;;  %v424_v58 = vsel %vm410_vm0, %v316_v0, %v403_v16  ;;  %v425_v57 = vsel %vm412_vm1, %v404_v29, %v405_v49 }
  0x5d   :  { %v408_v46 = vrot.slane %v370_v35, 2  ;;  %v409_v17 = vrot.slane %v379_v12, 1  ;;  %v421_v11 = vsel %vm420_vm5, %v417_v50, %v419_v3  ;;  %v426_v53 = vsel %vm414_vm2, %v424_v58, %v425_v57 }
  0x5e   :  { %v427_v42 = vsel %vm416_vm3, %v406_v30, %v407_v62  ;;  %v423_v19 = vsel %vm422_vm6, %v415_v10, %v421_v11 }
  0x5f   :  { %v428_v4 = vsel %vm418_vm4, %v408_v46, %v409_v17  ;;  %433 = vst [vmem:[#allocation7] sm:$0xff] %v423_v19 }
  0x60   :  { %v429_v1 = vsel %vm420_vm5, %v427_v42, %v428_v4 }
  0x61   :  { %v430_v14 = vsel %vm422_vm6, %v426_v53, %v429_v1 }
  0x62   :  { %434 = vst [vmem:[#allocation7 + $0x8] sm:$0xff] %v430_v14 }
  0x63   :  { %445 = dma.vmem_to_hbm [thread:$0]  %s441_s1, 256, %s443_s23, [#allocation4]  }
  0x64   :  { %534 = dma.done.wait [#allocation4], 256  }
  0x65   :  { %535 = vsyncadd [#allocation4], 4294967040 }
  0x66   :  { %450 = vsyncpa [#allocation3], 1 }
  0x67   :  { %451 = vsyncpa [#allocation6], 1 }
  0x68   :  { %452 = vsyncpa [#allocation4], 1 }

</bundles_post_ra>
